<compile_context>
chip_gen: v6e
topology: v6e:2x2x1
jax: 0.10.0
libtpu: 0.0.40
codegen_flags: <defaults>
</compile_context>

<pallas_src>
import jax
import jax.numpy as jnp
from jax.experimental import pallas as pl
from jax.experimental.pallas import tpu as pltpu

K_PAD = 896    # 784 padded to 7 * 128
H1 = 128       # fc1 width (already lane-aligned)
H2_PAD = 128   # fc2 width 64 padded to 128
OUT_PAD = 128  # logits 10 padded to 128


def mlp_kernel(x_ref, w1_ref, b1_ref, w2_ref, b2_ref, w3_ref, b3_ref, o_ref):
    # fc1 + relu  (bf16 inputs, f32 accumulate, bias on accumulator path)
    h1 = jnp.dot(x_ref[...], w1_ref[...], preferred_element_type=jnp.float32)
    h1 = jnp.maximum(h1 + b1_ref[...], 0.0).astype(jnp.bfloat16)
    # fc2 + relu (padded hidden cols have zero weights/bias -> stay exactly 0)
    h2 = jnp.dot(h1, w2_ref[...], preferred_element_type=jnp.float32)
    h2 = jnp.maximum(h2 + b2_ref[...], 0.0).astype(jnp.bfloat16)
    # fc3 (logits; padded output lanes are zero and sliced off in the wrapper)
    o = jnp.dot(h2, w3_ref[...], preferred_element_type=jnp.float32) + b3_ref[...]
    o_ref[...] = o.astype(o_ref.dtype)


def simple_nn_forward(x_nchw, params, *, tm=128):
    """x_nchw: (B, 1, 28, 28) float32 -> logits (B, 10) float32."""
    w1, b1, w2, b2, w3, b3 = params  # weights stored (in, out); biases (1, out)
    B = x_nchw.shape[0]
    x = x_nchw.reshape(B, 28 * 28)  # same semantics as torch x.view(-1, 784)

    # Pad batch to a multiple of the row tile and all feature dims to 128 lanes.
    b_pad = ((B + tm - 1) // tm) * tm

    xp = jnp.zeros((b_pad, K_PAD), jnp.bfloat16).at[:B, :784].set(
        x.astype(jnp.bfloat16))
    w1p = jnp.zeros((K_PAD, H1), jnp.bfloat16).at[:784, :].set(
        w1.astype(jnp.bfloat16))
    b1p = b1.reshape(1, H1).astype(jnp.float32)
    w2p = jnp.zeros((H1, H2_PAD), jnp.bfloat16).at[:, :64].set(
        w2.astype(jnp.bfloat16))
    b2p = jnp.zeros((1, H2_PAD), jnp.float32).at[:, :64].set(b2.reshape(1, 64))
    w3p = jnp.zeros((H2_PAD, OUT_PAD), jnp.bfloat16).at[:64, :10].set(
        w3.astype(jnp.bfloat16))
    b3p = jnp.zeros((1, OUT_PAD), jnp.float32).at[:, :10].set(b3.reshape(1, 10))

    out_pad = pl.pallas_call(
        mlp_kernel,
        out_shape=jax.ShapeDtypeStruct((b_pad, OUT_PAD), jnp.float32),
        grid=(b_pad // tm,),
        in_specs=[
            pl.BlockSpec((tm, K_PAD), lambda i: (i, 0)),       # x: tiled over batch
            pl.BlockSpec((K_PAD, H1), lambda i: (0, 0)),       # weights: constant
            pl.BlockSpec((1, H1), lambda i: (0, 0)),           #   index_map -> stay
            pl.BlockSpec((H1, H2_PAD), lambda i: (0, 0)),      #   VMEM-resident
            pl.BlockSpec((1, H2_PAD), lambda i: (0, 0)),
            pl.BlockSpec((H2_PAD, OUT_PAD), lambda i: (0, 0)),
            pl.BlockSpec((1, OUT_PAD), lambda i: (0, 0)),
        ],
        out_specs=pl.BlockSpec((tm, OUT_PAD), lambda i: (i, 0)),
        compiler_params=pltpu.CompilerParams(
            dimension_semantics=("parallel",)),                # v7x: 2 TCs split batch
    )(xp, w1p, b1p, w2p, b2p, w3p, b3p)

    return out_pad[:B, :10]


def init_params(key):
    """Deterministic init matching PyTorch Linear fan-in bounds (stored transposed)."""
    ks = jax.random.split(key, 6)

    def linear(kw, kb, fan_in, fan_out):
        bound = 1.0 / jnp.sqrt(fan_in)
        w = jax.random.uniform(kw, (fan_in, fan_out), jnp.float32, -bound, bound)
        b = jax.random.uniform(kb, (1, fan_out), jnp.float32, -bound, bound)
        return w, b

    w1, b1 = linear(ks[0], ks[1], 28 * 28, 128)
    w2, b2 = linear(ks[2], ks[3], 128, 64)
    w3, b3 = linear(ks[4], ks[5], 64, 10)
    return (w1, b1, w2, b2, w3, b3)


if __name__ == "__main__":
    key = jax.random.PRNGKey(0)
    k_param, k_x = jax.random.split(key)

    params = init_params(k_param)
    # Small MNIST-like batch: (B, C, H, W) = (8, 1, 28, 28), NCHW as in PyTorch.
    x = jax.random.normal(k_x, (8, 1, 28, 28), dtype=jnp.float32)

    logits = simple_nn_forward(x, params)
    logits = jax.block_until_ready(logits)

    # Pure-JAX reference using the same bf16-input / f32-accumulate recipe.
    w1, b1, w2, b2, w3, b3 = params
    xf = x.reshape(x.shape[0], -1).astype(jnp.bfloat16)
    h1 = jnp.maximum(
        jnp.dot(xf, w1.astype(jnp.bfloat16),
                preferred_element_type=jnp.float32) + b1, 0.0).astype(jnp.bfloat16)
    h2 = jnp.maximum(
        jnp.dot(h1, w2.astype(jnp.bfloat16),
                preferred_element_type=jnp.float32) + b2, 0.0).astype(jnp.bfloat16)
    ref = jnp.dot(h2, w3.astype(jnp.bfloat16),
                  preferred_element_type=jnp.float32) + b3

    assert logits.shape == (8, 10)
    assert jnp.allclose(logits, ref, atol=2e-2, rtol=2e-2), (
        float(jnp.max(jnp.abs(logits - ref))))

    print("KERNEL_OK")
</pallas_src>

<mosaic_0001>
module attributes {stable_mosaic.version = 11 : i64} {
  func.func @mlp_kernel(%arg0: i32, %arg1: memref<128x896xbf16, #tpu.memory_space<vmem>>, %arg2: memref<896x128xbf16, #tpu.memory_space<vmem>>, %arg3: memref<1x128xf32, #tpu.memory_space<vmem>>, %arg4: memref<128x128xbf16, #tpu.memory_space<vmem>>, %arg5: memref<1x128xf32, #tpu.memory_space<vmem>>, %arg6: memref<128x128xbf16, #tpu.memory_space<vmem>>, %arg7: memref<1x128xf32, #tpu.memory_space<vmem>>, %arg8: memref<128x128xf32, #tpu.memory_space<vmem>>) attributes {dimension_semantics = [#tpu.dimension_semantics<parallel>], iteration_bounds = array<i64: 1>, scalar_prefetch = 0 : i64, scratch_operands = 0 : i64, tpu.core_type = #tpu.core_type<tc>, window_params = [{transform_indices = @transform_0, window_bounds = array<i64: 128, 896>}, {pipeline_mode = #tpu.pipeline_mode<synchronous>, transform_indices = @transform_1, window_bounds = array<i64: 896, 128>}, {pipeline_mode = #tpu.pipeline_mode<synchronous>, transform_indices = @transform_2, window_bounds = array<i64: 1, 128>}, {pipeline_mode = #tpu.pipeline_mode<synchronous>, transform_indices = @transform_3, window_bounds = array<i64: 128, 128>}, {pipeline_mode = #tpu.pipeline_mode<synchronous>, transform_indices = @transform_4, window_bounds = array<i64: 1, 128>}, {pipeline_mode = #tpu.pipeline_mode<synchronous>, transform_indices = @transform_5, window_bounds = array<i64: 128, 128>}, {pipeline_mode = #tpu.pipeline_mode<synchronous>, transform_indices = @transform_6, window_bounds = array<i64: 1, 128>}, {transform_indices = @transform_7, window_bounds = array<i64: 128, 128>}]} {
    %c0 = arith.constant 0 : index
    %c0_0 = arith.constant 0 : index
    %0 = vector.load %arg1[%c0, %c0_0] : memref<128x896xbf16, #tpu.memory_space<vmem>>, vector<128x896xbf16>
    %c0_1 = arith.constant 0 : index
    %c0_2 = arith.constant 0 : index
    %1 = vector.load %arg2[%c0_1, %c0_2] : memref<896x128xbf16, #tpu.memory_space<vmem>>, vector<896x128xbf16>
    %cst = arith.constant dense<0.000000e+00> : vector<128x128xf32>
    %2 = tpu.matmul %0, %1, %cst {dimension_numbers = #tpu.dot_dimension_numbers<[1], [0], [0], [1], [0, 0, 1, 1], [], []>} : vector<128x896xbf16>, vector<896x128xbf16>, vector<128x128xf32> -> vector<128x128xf32>
    %c0_3 = arith.constant 0 : index
    %c0_4 = arith.constant 0 : index
    %3 = vector.load %arg3[%c0_3, %c0_4] : memref<1x128xf32, #tpu.memory_space<vmem>>, vector<1x128xf32>
    %4 = vector.broadcast %3 : vector<1x128xf32> to vector<128x128xf32>
    %5 = arith.addf %2, %4 : vector<128x128xf32>
    %cst_5 = arith.constant 0.000000e+00 : f32
    %6 = vector.broadcast %cst_5 : f32 to vector<128x128xf32>
    %7 = arith.maximumf %5, %6 : vector<128x128xf32>
    %8 = arith.truncf %7 : vector<128x128xf32> to vector<128x128xbf16>
    %c0_6 = arith.constant 0 : index
    %c0_7 = arith.constant 0 : index
    %9 = vector.load %arg4[%c0_6, %c0_7] : memref<128x128xbf16, #tpu.memory_space<vmem>>, vector<128x128xbf16>
    %cst_8 = arith.constant dense<0.000000e+00> : vector<128x128xf32>
    %10 = tpu.matmul %8, %9, %cst_8 {dimension_numbers = #tpu.dot_dimension_numbers<[1], [0], [0], [1], [0, 0, 1, 1], [], []>} : vector<128x128xbf16>, vector<128x128xbf16>, vector<128x128xf32> -> vector<128x128xf32>
    %c0_9 = arith.constant 0 : index
    %c0_10 = arith.constant 0 : index
    %11 = vector.load %arg5[%c0_9, %c0_10] : memref<1x128xf32, #tpu.memory_space<vmem>>, vector<1x128xf32>
    %12 = vector.broadcast %11 : vector<1x128xf32> to vector<128x128xf32>
    %13 = arith.addf %10, %12 : vector<128x128xf32>
    %cst_11 = arith.constant 0.000000e+00 : f32
    %14 = vector.broadcast %cst_11 : f32 to vector<128x128xf32>
    %15 = arith.maximumf %13, %14 : vector<128x128xf32>
    %16 = arith.truncf %15 : vector<128x128xf32> to vector<128x128xbf16>
    %c0_12 = arith.constant 0 : index
    %c0_13 = arith.constant 0 : index
    %17 = vector.load %arg6[%c0_12, %c0_13] : memref<128x128xbf16, #tpu.memory_space<vmem>>, vector<128x128xbf16>
    %cst_14 = arith.constant dense<0.000000e+00> : vector<128x128xf32>
    %18 = tpu.matmul %16, %17, %cst_14 {dimension_numbers = #tpu.dot_dimension_numbers<[1], [0], [0], [1], [0, 0, 1, 1], [], []>} : vector<128x128xbf16>, vector<128x128xbf16>, vector<128x128xf32> -> vector<128x128xf32>
    %c0_15 = arith.constant 0 : index
    %c0_16 = arith.constant 0 : index
    %19 = vector.load %arg7[%c0_15, %c0_16] : memref<1x128xf32, #tpu.memory_space<vmem>>, vector<1x128xf32>
    %20 = vector.broadcast %19 : vector<1x128xf32> to vector<128x128xf32>
    %21 = arith.addf %18, %20 : vector<128x128xf32>
    %c0_17 = arith.constant 0 : index
    %c0_18 = arith.constant 0 : index
    %22 = vector.load %arg8[%c0_17, %c0_18] : memref<128x128xf32, #tpu.memory_space<vmem>>, vector<128x128xf32>
    tpu.vector_store %arg8[%c0_17, %c0_18], %21 {strides = array<i32>} : memref<128x128xf32, #tpu.memory_space<vmem>>, vector<128x128xf32>,
    return
  }
  func.func @transform_0(%arg0: i32) -> (i32, i32) {
    %c0_i32 = arith.constant 0 : i32
    %c0_i32_0 = arith.constant 0 : i32
    return %arg0, %c0_i32 : i32, i32
  }
  func.func @transform_1(%arg0: i32) -> (i32, i32) {
    %c0_i32 = arith.constant 0 : i32
    %c0_i32_0 = arith.constant 0 : i32
    %c0_i32_1 = arith.constant 0 : i32
    return %c0_i32, %c0_i32_0 : i32, i32
  }
  func.func @transform_2(%arg0: i32) -> (i32, i32) {
    %c0_i32 = arith.constant 0 : i32
    %c0_i32_0 = arith.constant 0 : i32
    %c0_i32_1 = arith.constant 0 : i32
    return %c0_i32, %c0_i32_0 : i32, i32
  }
  func.func @transform_3(%arg0: i32) -> (i32, i32) {
    %c0_i32 = arith.constant 0 : i32
    %c0_i32_0 = arith.constant 0 : i32
    %c0_i32_1 = arith.constant 0 : i32
    return %c0_i32, %c0_i32_0 : i32, i32
  }
  func.func @transform_4(%arg0: i32) -> (i32, i32) {
    %c0_i32 = arith.constant 0 : i32
    %c0_i32_0 = arith.constant 0 : i32
    %c0_i32_1 = arith.constant 0 : i32
    return %c0_i32, %c0_i32_0 : i32, i32
  }
  func.func @transform_5(%arg0: i32) -> (i32, i32) {
    %c0_i32 = arith.constant 0 : i32
    %c0_i32_0 = arith.constant 0 : i32
    %c0_i32_1 = arith.constant 0 : i32
    return %c0_i32, %c0_i32_0 : i32, i32
  }
  func.func @transform_6(%arg0: i32) -> (i32, i32) {
    %c0_i32 = arith.constant 0 : i32
    %c0_i32_0 = arith.constant 0 : i32
    %c0_i32_1 = arith.constant 0 : i32
    return %c0_i32, %c0_i32_0 : i32, i32
  }
  func.func @transform_7(%arg0: i32) -> (i32, i32) {
    %c0_i32 = arith.constant 0 : i32
    %c0_i32_0 = arith.constant 0 : i32
    return %arg0, %c0_i32 : i32, i32
  }
}

</mosaic_0001>

<bundles_post_ra>
// kernel: tpu_custom_call.1
= control target key start
LH: loop header
LB: loop body
LE: loop exit
PB: predicated region body
PF: predicated region fallthrough
CT: control target
= control target key end

     0   :  { %12 = vsyncpa [#allocation3], 0  ;;  %s2703_s0 = inlined_call_operand.hbm [shape: bf16[128,896], index: 0, kind: input, shape index: {}]   ;;  %s2704_s1 = inlined_call_operand.hbm [shape: bf16[896,128], index: 1, kind: input, shape index: {}]   ;;  %s2705_s2 = inlined_call_operand.vmem [shape: f32[1,128], index: 2, kind: input, shape index: {}]   ;;  %s2706_s3 = inlined_call_operand.hbm [shape: bf16[128,128], index: 3, kind: input, shape index: {}]   ;;  %s2707_s4 = inlined_call_operand.vmem [shape: f32[1,128], index: 4, kind: input, shape index: {}]   ;;  %s2708_s5 = inlined_call_operand.hbm [shape: bf16[128,128], index: 5, kind: input, shape index: {}]   ;;  %s2709_s6 = inlined_call_operand.vmem [shape: f32[1,128], index: 6, kind: input, shape index: {}]   ;;  %s2710_s7 = inlined_call_operand.hbm [shape: f32[128,128], index: 7, kind: output, shape index: {}]  }
   0x1   :  { %13 = vsyncpa [#allocation6], 0 }
   0x2   :  { %14 = vsyncpa [#allocation9], 0 }
   0x3   :  { %15 = vsyncpa [#allocation4], 0  ;;  %s2451_s24 = smov [#allocation5]  }
   0x4   :  { %s33_s25 = sshll.u32 %s2451_s24, 4  ;;  %s34_s25 = int_to_ptr.vmem [resolvable:$true] %s33_s25 }
   0x5   :  { %s2351_s26 = scalar_lea.vmem %s34_s25, 7168  ;;  %p2356_p1 = scmp.lt.s32.totalorder %s34_s25, %s34_s25 }
   0x6   :  { %p2352_p0 = scmp.ne.s32.totalorder %s34_s25, %s2351_s26  ;;  %p2357_p2 = scmp.lt.s32.totalorder %s2351_s26, %s2351_s26 }
   0x8   :  { %p2358_p3 = por %p2357_p2, %p2356_p1 }
   0xa   :  { %p2359_p4 = pnand %p2358_p3, %p2352_p0 }
   0xc   :  { %2362 = shalt.err (!%p2359_p4)
}
   0xd   :  { %s2452_s27 = smov 64   ;;  %s2453_s28 = smov 4  }
   0xe   :  { %39 = dma.hbm_to_vmem [thread:$0]  %s2704_s1, 7168, %s34_s25, [#allocation6], %s2452_s27, %s2452_s27, %s2453_s28  }
   0xf   :  { %s2454_s8 = smov [#allocation2]  }
  0x10   :  { %s21_s9 = sshll.u32 %s2454_s8, 4  ;;  %s22_s9 = int_to_ptr.vmem [resolvable:$true] %s21_s9 }
  0x11   :  { %s2371_s10 = scalar_lea.vmem %s22_s9, 7168  ;;  %p2376_p6 = scmp.lt.s32.totalorder %s22_s9, %s22_s9 }
  0x12   :  { %p2372_p5 = scmp.ne.s32.totalorder %s22_s9, %s2371_s10  ;;  %p2377_p7 = scmp.lt.s32.totalorder %s2371_s10, %s2371_s10 }
  0x14   :  { %p2378_p8 = por %p2377_p7, %p2376_p6 }
  0x16   :  { %p2379_p9 = pnand %p2378_p8, %p2372_p5 }
  0x18   :  { %2382 = shalt.err (!%p2379_p9)
}
  0x19   :  { %s2455_s11 = smov 448   ;;  %s2456_s12 = smov 28  }
  0x1a   :  { %27 = dma.hbm_to_vmem [thread:$0]  %s2703_s0, 7168, %s22_s9, [#allocation3], %s2455_s11, %s2455_s11, %s2456_s12  }
  0x1b   :  { %s2457_s15 = smov [#allocation7]   ;;  %s2458_s17 = smov [#allocation8]  }
  0x1c   :  { %s47_s16 = sshll.u32 %s2457_s15, 4  ;;  %s61_s1 = sshll.u32 %s2458_s17, 4  ;;  %s48_s16 = int_to_ptr.vmem [resolvable:$true] %s47_s16  ;;  %s62_s1 = int_to_ptr.vmem [resolvable:$true] %s61_s1 }
  0x1d   :  { %s2391_s18 = scalar_lea.vmem %s48_s16, 1024  ;;  %p2396_p11 = scmp.lt.s32.totalorder %s48_s16, %s48_s16 }
  0x1e   :  { %p2392_p10 = scmp.ne.s32.totalorder %s48_s16, %s2391_s18  ;;  %p2397_p12 = scmp.lt.s32.totalorder %s2391_s18, %s2391_s18 }
  0x20   :  { %p2398_p13 = por %p2397_p12, %p2396_p11 }
  0x22   :  { %p2399_p0 = pnand %p2398_p13, %p2392_p10 }
  0x24   :  { %2402 = shalt.err (!%p2399_p0)
}
  0x25   :  { %53 = dma.hbm_to_vmem [thread:$0]  %s2706_s3, 1024, %s48_s16, [#allocation6], %s2452_s27, %s2452_s27, %s2453_s28  }
  0x26   :  { %s2411_s0 = scalar_lea.vmem %s62_s1, 1024  ;;  %p2416_p2 = scmp.lt.s32.totalorder %s62_s1, %s62_s1 }
  0x27   :  { %p2412_p1 = scmp.ne.s32.totalorder %s62_s1, %s2411_s0  ;;  %p2417_p3 = scmp.lt.s32.totalorder %s2411_s0, %s2411_s0 }
  0x29   :  { %p2418_p4 = por %p2417_p3, %p2416_p2 }
  0x2b   :  { %p2419_p5 = pnand %p2418_p4, %p2412_p1 }
  0x2d   :  { %2422 = shalt.err (!%p2419_p5)
}
  0x2e   :  { %67 = dma.hbm_to_vmem [thread:$0]  %s2708_s5, 1024, %s62_s1, [#allocation9], %s2452_s27, %s2452_s27, %s2453_s28  }
  0x2f   :  { %2443 = dma.done.wait [#allocation3], 7168  }
  0x30   :  { %2444 = vsyncadd [#allocation3], 4294960128 }
  0x31   :  { %2445 = dma.done.wait [#allocation6], 8192  }
  0x32   :  { %2446 = vsyncadd [#allocation6], 4294959104 }
  0x33   :  { %2447 = dma.done.wait [#allocation9], 1024  }
  0x34   :  { %2448 = vsyncadd [#allocation9], 4294966272  ;;  %v2191_v0 = vld [vmem:[#allocation5 + $0x78] sm:$0xff]   ;;  %v2195_v4 = vld [vmem:[#allocation5 + $0x70] sm:$0xff]  }
  0x35   :  { %v2192_v1 = vld [vmem:[#allocation5 + $0x38] sm:$0xff]   ;;  %1828 = vmatprep.subr.bf16.mxu0 %v2191_v0  ;;  %v2196_v5 = vld [vmem:[#allocation5 + $0x30] sm:$0xff]   ;;  %v2199_v8 = vld [vmem:[#allocation5 + $0x68] sm:$0xff]  }
  0x36   :  { %v2193_v2 = vld [vmem:[#allocation5 + $0xf8] sm:$0xff]   ;;  %1829 = vmatpush3.bf16.msra.mxu0 %v2192_v1  ;;  %v2197_v6 = vld [vmem:[#allocation5 + $0xf0] sm:$0xff]   ;;  %v2200_v9 = vld [vmem:[#allocation5 + $0x28] sm:$0xff]  }
  0x37   :  { %v2194_v3 = vld [vmem:[#allocation5 + $0xb8] sm:$0xff]   ;;  %1892 = vmatprep.subr.bf16.mxu1 %v2193_v2  ;;  %1830 = vmatprep.subr.bf16.mxu0 %v2195_v4  ;;  %v2198_v7 = vld [vmem:[#allocation5 + $0xb0] sm:$0xff]   ;;  %v2201_v10 = vld [vmem:[#allocation5 + $0xe8] sm:$0xff]  }
  0x38   :  { %1893 = vmatpush3.bf16.msra.mxu1 %v2194_v3  ;;  %v2202_v11 = vld [vmem:[#allocation5 + $0xa8] sm:$0xff]   ;;  %v2203_v12 = vld [vmem:[#allocation5 + $0x60] sm:$0xff]   ;;  %v2207_v16 = vld [vmem:[#allocation5 + $0x58] sm:$0xff]  }
  0x39   :  { %1894 = vmatprep.subr.bf16.mxu1 %v2197_v6  ;;  %v2204_v13 = vld [vmem:[#allocation5 + $0x20] sm:$0xff]   ;;  %v2208_v17 = vld [vmem:[#allocation5 + $0x18] sm:$0xff]   ;;  %v2211_v20 = vld [vmem:[#allocation5 + $0x50] sm:$0xff]  }
  0x3a   :  { %1831 = vmatpush3.bf16.msra.mxu0 %v2196_v5  ;;  %v2205_v14 = vld [vmem:[#allocation5 + $0xe0] sm:$0xff]   ;;  %v2209_v18 = vld [vmem:[#allocation5 + $0xd8] sm:$0xff]   ;;  %v2212_v21 = vld [vmem:[#allocation5 + $0x10] sm:$0xff]  }
  0x3b   :  { %1832 = vmatprep.subr.bf16.mxu0 %v2199_v8  ;;  %v2206_v15 = vld [vmem:[#allocation5 + $0xa0] sm:$0xff]   ;;  %v2210_v19 = vld [vmem:[#allocation5 + $0x98] sm:$0xff]   ;;  %v2213_v22 = vld [vmem:[#allocation5 + $0xd0] sm:$0xff]  }
  0x3c   :  { %1895 = vmatpush3.bf16.msra.mxu1 %v2198_v7  ;;  %v2214_v23 = vld [vmem:[#allocation5 + $0x90] sm:$0xff]   ;;  %v2215_v24 = vld [vmem:[#allocation5 + $0x48] sm:$0xff]   ;;  %v2219_v28 = vld [vmem:[#allocation5 + $0x40] sm:$0xff]  }
  0x3d   :  { %1896 = vmatprep.subr.bf16.mxu1 %v2201_v10  ;;  %v2216_v25 = vld [vmem:[#allocation5 + $0x8] sm:$0xff]   ;;  %v2220_v29 = vld [vmem:[#allocation5] sm:$0xff]   ;;  %v2226_v34 = vld [vmem:[#allocation5 + $0x178] sm:$0xff]  }
  0x3e   :  { %1833 = vmatpush3.bf16.msra.mxu0 %v2200_v9  ;;  %v2217_v26 = vld [vmem:[#allocation5 + $0xc8] sm:$0xff]   ;;  %v2221_v30 = vld [vmem:[#allocation5 + $0xc0] sm:$0xff]   ;;  %v2230_v37 = vld [vmem:[#allocation5 + $0x138] sm:$0xff]  }
  0x3f   :  { %1834 = vmatprep.subr.bf16.mxu0 %v2203_v12  ;;  %v2218_v27 = vld [vmem:[#allocation5 + $0x88] sm:$0xff]   ;;  %v2222_v31 = vld [vmem:[#allocation2] ss:$28 sps:$4 sm:$0xff]   ;;  %v2233_v39 = vld [vmem:[#allocation2 + $0x38] ss:$28 sps:$4 sm:$0xff]  }
  0x40   :  { %1897 = vmatpush3.bf16.msra.mxu1 %v2202_v11  ;;  %v2224_v32 = vld [vmem:[#allocation2 + $0x4] ss:$28 sps:$4 sm:$0xff]   ;;  %v2229_v36 = vld [vmem:[#allocation2 + $0xc] ss:$28 sps:$4 sm:$0xff]   ;;  %v2231_v38 = vld [vmem:[#allocation2 + $0x3c] ss:$28 sps:$4 sm:$0xff]  }
  0x41   :  { %1898 = vmatprep.subr.bf16.mxu1 %v2205_v14  ;;  %v2225_v33 = vld [vmem:[#allocation5 + $0x80] sm:$0xff]   ;;  %922 = vmatprep.mubr.bf16.mxu0 %v2224_v32  ;;  %v2234_v40 = vld [vmem:[#allocation5 + $0x170] sm:$0xff]   ;;  %v2242_v45 = vld [vmem:[#allocation5 + $0x168] sm:$0xff]  }
  0x42   :  { %1835 = vmatpush3.bf16.msra.mxu0 %v2204_v13  ;;  %v2227_v35 = vld [vmem:[#allocation2 + $0x8] ss:$28 sps:$4 sm:$0xff]   ;;  %1019 = vmatprep.mubr.bf16.mxu1 %v2229_v36  ;;  %v2237_v42 = vld [vmem:[#allocation5 + $0x130] sm:$0xff]   ;;  %v2238_v43 = vld [vmem:[#allocation2 + $0x40] ss:$28 sps:$4 sm:$0xff]  }
  0x43   :  { %1836 = vmatprep.subr.bf16.mxu0 %v2207_v16  ;;  %v2235_v41 = vld [vmem:[#allocation2 + $0x44] ss:$28 sps:$4 sm:$0xff]   ;;  %v2239_v44 = vld [vmem:[#allocation2 + $0x74] ss:$28 sps:$4 sm:$0xff]   ;;  %v2243_v46 = vld [vmem:[#allocation2 + $0x7c] ss:$28 sps:$4 sm:$0xff]  }
  0x44   :  { %1899 = vmatpush3.bf16.msra.mxu1 %v2206_v15  ;;  %v2245_v47 = vld [vmem:[#allocation5 + $0x128] sm:$0xff]   ;;  %v2250_v50 = vld [vmem:[#allocation5 + $0x160] sm:$0xff]   ;;  %v2246_v51 = vld [vmem:[#allocation2 + $0x78] ss:$28 sps:$4 sm:$0xff]  }
  0x45   :  { %1900 = vmatprep.subr.bf16.mxu1 %v2209_v18  ;;  %v2241_v48 = vld [vmem:[#allocation2 + $0x70] ss:$28 sps:$4 sm:$0xff]   ;;  %v2253_v52 = vld [vmem:[#allocation5 + $0x120] sm:$0xff]   ;;  %v2258_v54 = vld [vmem:[#allocation5 + $0x158] sm:$0xff]  }
  0x46   :  { %1837 = vmatpush3.bf16.msra.mxu0 %v2208_v17  ;;  %v2247_v49 = vld [vmem:[#allocation2 + $0xac] ss:$28 sps:$4 sm:$0xff]   ;;  %v2251_v53 = vld [vmem:[#allocation2 + $0xb4] ss:$28 sps:$4 sm:$0xff]   ;;  %v2261_v56 = vld [vmem:[#allocation5 + $0x118] sm:$0xff]  }
  0x47   :  { %1838 = vmatprep.subr.bf16.mxu0 %v2211_v20  ;;  %v2249_v55 = vld [vmem:[#allocation2 + $0xa8] ss:$28 sps:$4 sm:$0xff]   ;;  %v2263_v58 = vld [vmem:[#allocation5 + $0x1b8] sm:$0xff]   ;;  %v2254_v59 = vld [vmem:[#allocation2 + $0xb0] ss:$28 sps:$4 sm:$0xff]  }
  0x48   :  { %1901 = vmatpush3.bf16.msra.mxu1 %v2210_v19  ;;  %v2255_v57 = vld [vmem:[#allocation2 + $0xe4] ss:$28 sps:$4 sm:$0xff]   ;;  %v2259_v60 = vld [vmem:[#allocation2 + $0xec] ss:$28 sps:$4 sm:$0xff]   ;;  %v2267_v61 = vld [vmem:[#allocation5 + $0x150] sm:$0xff]  }
  0x49   :  { %1902 = vmatprep.subr.bf16.mxu1 %v2213_v22  ;;  %v2268_v62 = vld [vmem:[#allocation5 + $0x1b0] sm:$0xff]   ;;  %v2273_v0 = vld [vmem:[#allocation5 + $0x1a8] sm:$0xff]   ;;  %v2257_v1 = vld [vmem:[#allocation2 + $0xe0] ss:$28 sps:$4 sm:$0xff]  }
  0x4a   :  { %1839 = vmatpush3.bf16.msra.mxu0 %v2212_v21  ;;  %v2271_v63 = vld [vmem:[#allocation5 + $0x110] sm:$0xff]   ;;  %v2262_v2 = vld [vmem:[#allocation2 + $0xe8] ss:$28 sps:$4 sm:$0xff]   ;;  %v2264_v3 = vld [vmem:[#allocation2 + $0x11c] ss:$28 sps:$4 sm:$0xff]  }
  0x4b   :  { %1840 = vmatprep.subr.bf16.mxu0 %v2215_v24  ;;  %v2277_v4 = vld [vmem:[#allocation5 + $0x148] sm:$0xff]   ;;  %v2278_v5 = vld [vmem:[#allocation5 + $0x1a0] sm:$0xff]   ;;  %v2283_v8 = vld [vmem:[#allocation5 + $0x198] sm:$0xff]  }
  0x4c   :  { %1903 = vmatpush3.bf16.msra.mxu1 %v2214_v23  ;;  %v2269_v6 = vld [vmem:[#allocation2 + $0x124] ss:$28 sps:$4 sm:$0xff]   ;;  %v2281_v7 = vld [vmem:[#allocation5 + $0x108] sm:$0xff]   ;;  %v2266_v9 = vld [vmem:[#allocation2 + $0x118] ss:$28 sps:$4 sm:$0xff]  }
  0x4d   :  { %1904 = vmatprep.subr.bf16.mxu1 %v2217_v26  ;;  %v2287_v10 = vld [vmem:[#allocation5 + $0x140] sm:$0xff]   ;;  %v2274_v12 = vld [vmem:[#allocation2 + $0x154] ss:$28 sps:$4 sm:$0xff]   ;;  %v2279_v15 = vld [vmem:[#allocation2 + $0x15c] ss:$28 sps:$4 sm:$0xff]  }
  0x4e   :  { %1841 = vmatpush3.bf16.msra.mxu0 %v2216_v25  ;;  %v2272_v11 = vld [vmem:[#allocation2 + $0x120] ss:$28 sps:$4 sm:$0xff]   ;;  %v2288_v13 = vld [vmem:[#allocation5 + $0x190] sm:$0xff]   ;;  %v2293_v16 = vld [vmem:[#allocation5 + $0x188] sm:$0xff]  }
  0x4f   :  { %1842 = vmatprep.subr.bf16.mxu0 %v2219_v28  ;;  %v2291_v14 = vld [vmem:[#allocation5 + $0x100] sm:$0xff]   ;;  %v2276_v17 = vld [vmem:[#allocation2 + $0x150] ss:$28 sps:$4 sm:$0xff]   ;;  %v2282_v20 = vld [vmem:[#allocation2 + $0x158] ss:$28 sps:$4 sm:$0xff]  }
  0x50   :  { %1905 = vmatpush3.bf16.msra.mxu1 %v2218_v27  ;;  %v2284_v18 = vld [vmem:[#allocation2 + $0x18c] ss:$28 sps:$4 sm:$0xff]   ;;  %v2297_v19 = vld [vmem:[#allocation5 + $0x180] sm:$0xff]   ;;  %v2289_v21 = vld [vmem:[#allocation2 + $0x194] ss:$28 sps:$4 sm:$0xff]  }
  0x51   :  { %1906 = vmatprep.subr.bf16.mxu1 %v2221_v30  ;;  %v2286_v22 = vld [vmem:[#allocation2 + $0x188] ss:$28 sps:$4 sm:$0xff]   ;;  %v2296_v23 = vld [vmem:[#allocation2 + $0x14] ss:$28 sps:$4 sm:$0xff]   ;;  %v2307_v32 = vld [vmem:[#allocation2 + $0xc0] ss:$28 sps:$4 sm:$0xff]  }
  0x52   :  { %1843 = vmatpush3.bf16.msra.mxu0 %v2220_v29  ;;  %v2292_v24 = vld [vmem:[#allocation2 + $0x190] ss:$28 sps:$4 sm:$0xff]   ;;  %v2298_v25 = vld [vmem:[#allocation2 + $0x18] ss:$28 sps:$4 sm:$0xff]   ;;  %v2306_v29 = vld [vmem:[#allocation2 + $0x88] ss:$28 sps:$4 sm:$0xff]  }
  0x53   :  { %1956 = vmatprep.subr.bf16.mxu0 %v2226_v34  ;;  %v2294_v26 = vld [vmem:[#allocation2 + $0x10] ss:$28 sps:$4 sm:$0xff]   ;;  %v2302_v30 = vld [vmem:[#allocation2 + $0x48] ss:$28 sps:$4 sm:$0xff]   ;;  %v2305_v34 = vld [vmem:[#allocation2 + $0x80] ss:$28 sps:$4 sm:$0xff]  }
  0x54   :  { %1907 = vmatpush3.bf16.msra.mxu1 %v2225_v33  ;;  %v2300_v27 = vld [vmem:[#allocation2 + $0x4c] ss:$28 sps:$4 sm:$0xff]   ;;  %v2314_v33 = vld [vmem:[#allocation2 + $0xf8] ss:$28 sps:$4 sm:$0xff]  }
  0x55   :  { %923 = vmatmul.mubr.bf16.vlgmr.msra.gmra.mxu0 %v2222_v31  ;;  %2068 = vmatprep.subr.bf16.mxu1 %v2263_v58  ;;  %v2299_v28 = vld [vmem:[#allocation2 + $0x50] ss:$28 sps:$4 sm:$0xff]   ;;  %v2303_v31 = vld [vmem:[#allocation2 + $0x84] ss:$28 sps:$4 sm:$0xff]  }
  0x56   :  { %1957 = vmatpush3.bf16.msra.mxu0 %v2230_v37  ;;  %930 = vmatprep.mubr.bf16.mxu0 %v2231_v38  ;;  %v2315_v36 = vld [vmem:[#allocation2 + $0x130] ss:$28 sps:$4 sm:$0xff]   ;;  %v2322_v37 = vld [vmem:[#allocation2 + $0x168] ss:$28 sps:$4 sm:$0xff]   ;;  %v2310_v38 = vld [vmem:[#allocation2 + $0xb8] ss:$28 sps:$4 sm:$0xff]  }
  0x57   :  { %1020 = vmatmul.mubr.bf16.vlgmr.msra.gmra.mxu1 %v2227_v35  ;;  %1958 = vmatprep.subr.bf16.mxu0 %v2234_v40  ;;  %v2308_v35 = vld [vmem:[#allocation2 + $0xbc] ss:$28 sps:$4 sm:$0xff]  }
  0x58   :  { %1027 = vmatprep.mubr.bf16.mxu1 %v2235_v41  ;;  %2069 = vmatpush3.bf16.msra.mxu1 %v2263_v58  ;;  %v2323_v40 = vld [vmem:[#allocation2 + $0x1a0] ss:$28 sps:$4 sm:$0xff]   ;;  %v2313_v41 = vld [vmem:[#allocation2 + $0xf0] ss:$28 sps:$4 sm:$0xff]  }
  0x59   :  { %2070 = vmatprep.subr.bf16.mxu1 %v2268_v62 }
  0x5a   :  { %1959 = vmatpush3.bf16.msra.mxu0 %v2237_v42  ;;  %v2316_v42 = vld [vmem:[#allocation2 + $0x12c] ss:$28 sps:$4 sm:$0xff]  }
  0x5b   :  { %1960 = vmatprep.subr.bf16.mxu0 %v2242_v45  ;;  %v2321_v45 = vld [vmem:[#allocation2 + $0x160] ss:$28 sps:$4 sm:$0xff]  }
  0x5c   :  { %2071 = vmatpush3.bf16.msra.mxu1 %v2268_v62 }
  0x5d   :  { %931 = vmatmul.mubr.bf16.gmra.mxu0 %v2233_v39  ;;  %2072 = vmatprep.subr.bf16.mxu1 %v2273_v0  ;;  %v2311_v39 = vld [vmem:[#allocation2 + $0xf4] ss:$28 sps:$4 sm:$0xff]  }
  0x5e   :  { %938 = vmatprep.mubr.bf16.mxu0 %v2239_v44  ;;  %1961 = vmatpush3.bf16.msra.mxu0 %v2245_v47  ;;  %v2319_v44 = vld [vmem:[#allocation2 + $0x164] ss:$28 sps:$4 sm:$0xff]   ;;  %v2326_v47 = vld [vmem:[#allocation2 + $0x198] ss:$28 sps:$4 sm:$0xff]  }
  0x5f   :  { %1028 = vmatmul.mubr.bf16.gmra.mxu1 %v2238_v43  ;;  %1962 = vmatprep.subr.bf16.mxu0 %v2250_v50  ;;  %v2318_v43 = vld [vmem:[#allocation2 + $0x128] ss:$28 sps:$4 sm:$0xff]  }
  0x60   :  { %1035 = vmatprep.mubr.bf16.mxu1 %v2243_v46  ;;  %2073 = vmatpush3.bf16.msra.mxu1 %v2273_v0  ;;  %v2324_v46 = vld [vmem:[#allocation2 + $0x19c] ss:$28 sps:$4 sm:$0xff]   ;;  %v2329_v50 = vld [vmem:[#allocation7 + $0x28] sm:$0xff]  }
  0x61   :  { %2074 = vmatprep.subr.bf16.mxu1 %v2278_v5 }
  0x62   :  { %1963 = vmatpush3.bf16.msra.mxu0 %v2253_v52  ;;  %v2331_v52 = vld [vmem:[#allocation7 + $0x18] sm:$0xff]  }
  0x63   :  { %1964 = vmatprep.subr.bf16.mxu0 %v2258_v54  ;;  %v2333_v54 = vld [vmem:[#allocation7 + $0x8] sm:$0xff]  }
  0x64   :  { %2075 = vmatpush3.bf16.msra.mxu1 %v2278_v5 }
  0x65   :  { %939 = vmatmul.mubr.bf16.gmra.mxu0 %v2241_v48  ;;  %2076 = vmatprep.subr.bf16.mxu1 %v2283_v8  ;;  %v2327_v48 = vld [vmem:[#allocation7 + $0x38] sm:$0xff]  }
  0x66   :  { %946 = vmatprep.mubr.bf16.mxu0 %v2247_v49  ;;  %1965 = vmatpush3.bf16.msra.mxu0 %v2261_v56  ;;  %v2328_v49 = vld [vmem:[#allocation7 + $0x30] sm:$0xff]  }
  0x67   :  { %1036 = vmatmul.mubr.bf16.gmra.mxu1 %v2246_v51  ;;  %1966 = vmatprep.subr.bf16.mxu0 %v2267_v61  ;;  %v2330_v51 = vld [vmem:[#allocation7 + $0x20] sm:$0xff]  }
  0x68   :  { %1043 = vmatprep.mubr.bf16.mxu1 %v2251_v53  ;;  %2077 = vmatpush3.bf16.msra.mxu1 %v2283_v8  ;;  %v2332_v53 = vld [vmem:[#allocation7 + $0x10] sm:$0xff]  }
  0x69   :  { %2078 = vmatprep.subr.bf16.mxu1 %v2288_v13 }
  0x6a   :  { %1967 = vmatpush3.bf16.msra.mxu0 %v2271_v63 }
  0x6b   :  { %1968 = vmatprep.subr.bf16.mxu0 %v2277_v4 }
  0x6c   :  { %2079 = vmatpush3.bf16.msra.mxu1 %v2288_v13 }
  0x6d   :  { %947 = vmatmul.mubr.bf16.gmra.mxu0 %v2249_v55  ;;  %2080 = vmatprep.subr.bf16.mxu1 %v2293_v16  ;;  %v2334_v55 = vld [vmem:[#allocation7] sm:$0xff]  }
  0x6e   :  { %954 = vmatprep.mubr.bf16.mxu0 %v2255_v57  ;;  %1969 = vmatpush3.bf16.msra.mxu0 %v2281_v7  ;;  %v2526_v57 = vld [vmem:[%s2705_s2] ss:$0 sm:$0xff]  ;;  %v2541_v7 = vld [vmem:[#allocation8 + $0x30] sm:$0xff]  }
  0x6f   :  { %1044 = vmatmul.mubr.bf16.gmra.mxu1 %v2254_v59  ;;  %1970 = vmatprep.subr.bf16.mxu0 %v2287_v10 }
  0x70   :  { %1051 = vmatprep.mubr.bf16.mxu1 %v2259_v60  ;;  %2081 = vmatpush3.bf16.msra.mxu1 %v2293_v16 }
  0x71   :  { %2082 = vmatprep.subr.bf16.mxu1 %v2297_v19 }
  0x72   :  { %1971 = vmatpush3.bf16.msra.mxu0 %v2291_v14  ;;  %v2550_v14 = vld [vmem:[#allocation8 + $0x28] sm:$0xff]  }
  0x74   :  { %2083 = vmatpush3.bf16.msra.mxu1 %v2297_v19 }
  0x75   :  { %955 = vmatmul.mubr.bf16.gmra.mxu0 %v2257_v1  ;;  %2100 = vmatprep.subr.bf16.mxu1 %v2327_v48 }
  0x76   :  { %962 = vmatprep.mubr.bf16.mxu0 %v2264_v3 }
  0x77   :  { %1052 = vmatmul.mubr.bf16.gmra.mxu1 %v2262_v2 }
  0x78   :  { %1059 = vmatprep.mubr.bf16.mxu1 %v2269_v6  ;;  %v2539_v6 = vld [vmem:[#allocation8 + $0x38] sm:$0xff]  }
  0x79   :  { %2132 = vmatprep.subr.bf16.mxu0 %v2539_v6 }
  0x7d   :  { %963 = vmatmul.mubr.bf16.gmra.mxu0 %v2266_v9 }
  0x7e   :  { %970 = vmatprep.mubr.bf16.mxu0 %v2274_v12 }
  0x7f   :  { %1060 = vmatmul.mubr.bf16.gmra.mxu1 %v2272_v11 }
  0x80   :  { %1067 = vmatprep.mubr.bf16.mxu1 %v2279_v15 }
  0x85   :  { %971 = vmatmul.mubr.bf16.gmra.mxu0 %v2276_v17 }
  0x86   :  { %978 = vmatprep.mubr.bf16.mxu0 %v2284_v18 }
  0x87   :  { %1068 = vmatmul.mubr.bf16.gmra.mxu1 %v2282_v20 }
  0x88   :  { %1075 = vmatprep.mubr.bf16.mxu1 %v2289_v21  ;;  %v2562_v21 = vld [vmem:[#allocation8 + $0x20] sm:$0xff]  }
  0x8d   :  { %979 = vmatmul.mubr.bf16.gmra.mxu0 %v2286_v22 }
  0x8e   :  { %1116 = vmatprep.mubr.bf16.mxu0 %v2296_v23 }
  0x8f   :  { %1076 = vmatmul.mubr.bf16.gmra.mxu1 %v2292_v24 }
  0x90   :  { %2084 = vmatprep.mubr.bf16.mxu1 %v2298_v25 }
  0x95   :  { %1117 = vmatmul.mubr.bf16.vlgmr.msra.gmra.mxu0 %v2294_v26 }
  0x96   :  { %1124 = vmatprep.mubr.bf16.mxu0 %v2300_v27  ;;  %2133 = vmatpush3.bf16.msra.mxu0 %v2539_v6 }
  0x97   :  { %2085 = vmatmul.mubr.bf16.vlgmr.msra.gmra.mxu1 %v2299_v28  ;;  %2134 = vmatprep.subr.bf16.mxu0 %v2541_v7  ;;  %v2569_v28 = vld [vmem:[#allocation8 + $0x18] sm:$0xff]  }
  0x98   :  { %2088 = vmatprep.mubr.bf16.mxu1 %v2306_v29  ;;  %2101 = vmatpush3.bf16.msra.mxu1 %v2327_v48 }
  0x99   :  { %2102 = vmatprep.subr.bf16.mxu1 %v2328_v49 }
  0x9a   :  { %2135 = vmatpush3.bf16.msra.mxu0 %v2541_v7 }
  0x9b   :  { %2136 = vmatprep.subr.bf16.mxu0 %v2550_v14 }
  0x9c   :  { %2103 = vmatpush3.bf16.msra.mxu1 %v2328_v49 }
  0x9d   :  { %1125 = vmatmul.mubr.bf16.gmra.mxu0 %v2302_v30  ;;  %2104 = vmatprep.subr.bf16.mxu1 %v2329_v50 }
  0x9e   :  { %1132 = vmatprep.mubr.bf16.mxu0 %v2303_v31  ;;  %2137 = vmatpush3.bf16.msra.mxu0 %v2550_v14 }
  0x9f   :  { %2089 = vmatmul.mubr.bf16.gmra.mxu1 %v2307_v32  ;;  %2138 = vmatprep.subr.bf16.mxu0 %v2562_v21 }
  0xa0   :  { %2092 = vmatprep.mubr.bf16.mxu1 %v2314_v33  ;;  %2105 = vmatpush3.bf16.msra.mxu1 %v2329_v50 }
  0xa1   :  { %2106 = vmatprep.subr.bf16.mxu1 %v2330_v51 }
  0xa2   :  { %2139 = vmatpush3.bf16.msra.mxu0 %v2562_v21 }
  0xa3   :  { %2140 = vmatprep.subr.bf16.mxu0 %v2569_v28 }
  0xa4   :  { %2107 = vmatpush3.bf16.msra.mxu1 %v2330_v51 }
  0xa5   :  { %1133 = vmatmul.mubr.bf16.gmra.mxu0 %v2305_v34  ;;  %2108 = vmatprep.subr.bf16.mxu1 %v2331_v52 }
  0xa6   :  { %1140 = vmatprep.mubr.bf16.mxu0 %v2308_v35  ;;  %2141 = vmatpush3.bf16.msra.mxu0 %v2569_v28 }
  0xa7   :  { %2093 = vmatmul.mubr.bf16.gmra.mxu1 %v2315_v36 }
  0xa8   :  { %2096 = vmatprep.mubr.bf16.mxu1 %v2322_v37  ;;  %2109 = vmatpush3.bf16.msra.mxu1 %v2331_v52 }
  0xa9   :  { %2110 = vmatprep.subr.bf16.mxu1 %v2332_v53 }
  0xac   :  { %2111 = vmatpush3.bf16.msra.mxu1 %v2332_v53 }
  0xad   :  { %1141 = vmatmul.mubr.bf16.gmra.mxu0 %v2310_v38  ;;  %2112 = vmatprep.subr.bf16.mxu1 %v2333_v54 }
  0xae   :  { %1148 = vmatprep.mubr.bf16.mxu0 %v2311_v39 }
  0xaf   :  { %2097 = vmatmul.mubr.bf16.gmra.mxu1 %v2323_v40 }
  0xb0   :  { %2113 = vmatpush3.bf16.msra.mxu1 %v2333_v54 }
  0xb1   :  { %2114 = vmatprep.subr.bf16.mxu1 %v2334_v55 }
  0xb4   :  { %2115 = vmatpush3.bf16.msra.mxu1 %v2334_v55 }
  0xb5   :  { %1149 = vmatmul.mubr.bf16.gmra.mxu0 %v2313_v41  ;;  %2164 = vmatprep.subr.bf16.mxu1 %v2539_v6 }
  0xb6   :  { %1156 = vmatprep.mubr.bf16.mxu0 %v2316_v42 }
  0xbd   :  { %1157 = vmatmul.mubr.bf16.gmra.mxu0 %v2318_v43 }
  0xbe   :  { %1164 = vmatprep.mubr.bf16.mxu0 %v2319_v44 }
  0xc5   :  { %1165 = vmatmul.mubr.bf16.gmra.mxu0 %v2321_v45 }
  0xc6   :  { %1172 = vmatprep.mubr.bf16.mxu0 %v2324_v46 }
  0xcd   :  { %1173 = vmatmul.mubr.bf16.gmra.mxu0 %v2326_v47 }
 0x115   :  { %v1844_v56 = vpop.f32.mrf.mxu0 }
 0x117   :  { %v1845_v58 = vpop.f32.mrf.mxu0  ;;  %v1908_v60 = vpop.f32.mrf.mxu1 }
 0x118   :  { %v1846_v59 = vadd.f32 %v1845_v58, %v1844_v56 }
 0x119   :  { %v2528_v61 = vpop.f32.mrf.mxu0  ;;  %v1909_v63 = vpop.f32.mrf.mxu1 }
 0x11a   :  { %v925_v62 = vadd.f32 %v1846_v59, %v2526_v57  ;;  %v1910_v0 = vadd.f32 %v1909_v63, %v1908_v60 }
 0x11b   :  { %v2531_v1 = vpop.f32.mrf.mxu0  ;;  %v2533_v2 = vpop.f32.mrf.mxu1 }
 0x11c   :  { %v2535_v3 = vadd.f32 %v1910_v0, %v925_v62 }
 0x11d   :  { %v1850_v4 = vpop.f32.mrf.mxu0  ;;  %v2537_v5 = vpop.f32.mrf.mxu1 }
 0x11f   :  { %v1851_v8 = vpop.f32.mrf.mxu0  ;;  %v1914_v10 = vpop.f32.mrf.mxu1 }
 0x120   :  { %v1852_v9 = vadd.f32 %v1851_v8, %v1850_v4 }
 0x121   :  { %v2545_v11 = vpop.f32.mrf.mxu0  ;;  %v1915_v13 = vpop.f32.mrf.mxu1 }
 0x122   :  { %v933_v12 = vadd.f32 %v1852_v9, %v2526_v57  ;;  %v1916_v15 = vadd.f32 %v1915_v13, %v1914_v10 }
 0x123   :  { %v2552_v16 = vpop.f32.mrf.mxu0  ;;  %v2554_v17 = vpop.f32.mrf.mxu1 }
 0x124   :  { %v2556_v18 = vadd.f32 %v1916_v15, %v933_v12 }
 0x125   :  { %v1856_v19 = vpop.f32.mrf.mxu0  ;;  %v2559_v20 = vpop.f32.mrf.mxu1 }
 0x127   :  { %v1857_v22 = vpop.f32.mrf.mxu0  ;;  %v1920_v24 = vpop.f32.mrf.mxu1 }
 0x128   :  { %v1858_v23 = vadd.f32 %v1857_v22, %v1856_v19 }
 0x129   :  { %v2564_v25 = vpop.f32.mrf.mxu0  ;;  %v1921_v27 = vpop.f32.mrf.mxu1 }
 0x12a   :  { %v941_v26 = vadd.f32 %v1858_v23, %v2526_v57  ;;  %v1922_v29 = vadd.f32 %v1921_v27, %v1920_v24 }
 0x12b   :  { %v2571_v30 = vpop.f32.mrf.mxu0  ;;  %v2573_v31 = vpop.f32.mrf.mxu1 }
 0x12c   :  { %v2575_v32 = vadd.f32 %v1922_v29, %v941_v26 }
 0x12d   :  { %v1862_v33 = vpop.f32.mrf.mxu0  ;;  %v2578_v34 = vpop.f32.mrf.mxu1 }
 0x12f   :  { %v1863_v35 = vpop.f32.mrf.mxu0  ;;  %v1926_v37 = vpop.f32.mrf.mxu1 }
 0x130   :  { %v1864_v36 = vadd.f32 %v1863_v35, %v1862_v33 }
 0x131   :  { %v2581_v38 = vpop.f32.mrf.mxu0  ;;  %v1927_v40 = vpop.f32.mrf.mxu1 }
 0x132   :  { %v949_v39 = vadd.f32 %v1864_v36, %v2526_v57  ;;  %v1928_v41 = vadd.f32 %v1927_v40, %v1926_v37 }
 0x133   :  { %v2585_v42 = vpop.f32.mrf.mxu0  ;;  %v2587_v43 = vpop.f32.mrf.mxu1 }
 0x134   :  { %v2589_v44 = vadd.f32 %v1928_v41, %v949_v39 }
 0x135   :  { %v1868_v45 = vpop.f32.mrf.mxu0  ;;  %v2591_v46 = vpop.f32.mrf.mxu1 }
 0x137   :  { %v1869_v47 = vpop.f32.mrf.mxu0  ;;  %v1932_v49 = vpop.f32.mrf.mxu1 }
 0x138   :  { %v1870_v48 = vadd.f32 %v1869_v47, %v1868_v45 }
 0x139   :  { %v2593_v50 = vpop.f32.mrf.mxu0  ;;  %v1933_v52 = vpop.f32.mrf.mxu1 }
 0x13a   :  { %v957_v51 = vadd.f32 %v1870_v48, %v2526_v57  ;;  %v1934_v53 = vadd.f32 %v1933_v52, %v1932_v49 }
 0x13b   :  { %v2596_v54 = vpop.f32.mrf.mxu0  ;;  %v2598_v55 = vpop.f32.mrf.mxu1 }
 0x13c   :  { %v2600_v56 = vadd.f32 %v1934_v53, %v957_v51 }
 0x13d   :  { %v1874_v58 = vpop.f32.mrf.mxu0  ;;  %v2602_v59 = vpop.f32.mrf.mxu1 }
 0x13f   :  { %v1875_v60 = vpop.f32.mrf.mxu0  ;;  %v1938_v63 = vpop.f32.mrf.mxu1 }
 0x140   :  { %v1876_v62 = vadd.f32 %v1875_v60, %v1874_v58  ;;  %v1849_v58 = vadd.f32 %v2531_v1, %v2528_v61 }
 0x141   :  { %v2604_v0 = vpop.f32.mrf.mxu0  ;;  %v1939_v8 = vpop.f32.mrf.mxu1 }
 0x142   :  { %v965_v4 = vadd.f32 %v1876_v62, %v2526_v57  ;;  %v1940_v9 = vadd.f32 %v1939_v8, %v1938_v63 }
 0x143   :  { %v2607_v10 = vpop.f32.mrf.mxu0  ;;  %v2609_v12 = vpop.f32.mrf.mxu1 }
 0x144   :  { %v2611_v13 = vadd.f32 %v1940_v9, %v965_v4  ;;  %v928_v9 = vadd.f32 %v1849_v58, %v2526_v57 }
 0x145   :  { %v1880_v15 = vpop.f32.mrf.mxu0  ;;  %v2613_v19 = vpop.f32.mrf.mxu1 }
 0x147   :  { %v1881_v22 = vpop.f32.mrf.mxu0  ;;  %v1944_v24 = vpop.f32.mrf.mxu1 }
 0x148   :  { %v1882_v23 = vadd.f32 %v1881_v22, %v1880_v15  ;;  %v1913_v15 = vadd.f32 %v2537_v5, %v2533_v2  ;;  %v1919_v5 = vadd.f32 %v2559_v20, %v2554_v17 }
 0x149   :  { %v2615_v26 = vpop.f32.mrf.mxu0  ;;  %v1945_v29 = vpop.f32.mrf.mxu1 }
 0x14a   :  { %v973_v27 = vadd.f32 %v1882_v23, %v2526_v57  ;;  %v1946_v33 = vadd.f32 %v1945_v29, %v1944_v24  ;;  %v1025_v1 = vadd.f32 %v1913_v15, %v928_v9 }
 0x14b   :  { %v2618_v35 = vpop.f32.mrf.mxu0  ;;  %v2620_v36 = vpop.f32.mrf.mxu1 }
 0x14c   :  { %v2622_v37 = vadd.f32 %v1946_v33, %v973_v27  ;;  %v1855_v33 = vadd.f32 %v2552_v16, %v2545_v11 }
 0x14d   :  { %v1886_v39 = vpop.f32.mrf.mxu0  ;;  %v2624_v40 = vpop.f32.mrf.mxu1 }
 0x14e   :  { %v936_v2 = vadd.f32 %v1855_v33, %v2526_v57 }
 0x14f   :  { %v1887_v41 = vpop.f32.mrf.mxu0  ;;  %v1950_v47 = vpop.f32.mrf.mxu1 }
 0x150   :  { %v1888_v45 = vadd.f32 %v1887_v41, %v1886_v39 }
 0x151   :  { %v2626_v48 = vpop.f32.mrf.mxu0  ;;  %v1951_v51 = vpop.f32.mrf.mxu1 }
 0x152   :  { %v981_v49 = vadd.f32 %v1888_v45, %v2526_v57  ;;  %v1952_v52 = vadd.f32 %v1951_v51, %v1950_v47 }
 0x153   :  { %v2629_v53 = vpop.f32.mrf.mxu0  ;;  %v2633_v60 = vpop.f32.mrf.mxu1 }
 0x154   :  { %v2635_v62 = vadd.f32 %v1952_v52, %v981_v49 }
 0x155   :  { %v1972_v63 = vpop.f32.mrf.mxu0  ;;  %v2637_v4 = vpop.f32.mrf.mxu1 }
 0x157   :  { %v1973_v8 = vpop.f32.mrf.mxu0  ;;  %v2086_v23 = vpop.f32.mrf.mxu1 }
 0x158   :  { %v1974_v22 = vadd.f32 %v1973_v8, %v1972_v63 }
 0x159   :  { %v1975_v24 = vpop.f32.mrf.mxu0  ;;  %v1215_v29 = vpop.f32.mrf.mxu1 }
 0x15a   :  { %v1119_v27 = vadd.f32 %v1974_v22, %v2535_v3  ;;  %v1033_v22 = vadd.f32 %v1919_v5, %v936_v2 }
 0x15b   :  { %v1976_v61 = vpop.f32.mrf.mxu0  ;;  %v2087_v41 = vpop.f32.mrf.mxu1 }
 0x15c   :  { %v1977_v39 = vadd.f32 %v1976_v61, %v1975_v24  ;;  %v1216_v47 = vadd.f32 %v1215_v29, %v1119_v27  ;;  %v1861_v24 = vadd.f32 %v2571_v30, %v2564_v25 }
 0x15d   :  { %v1978_v45 = vpop.f32.mrf.mxu0  ;;  %v1218_v51 = vpop.f32.mrf.mxu1 }
 0x15e   :  { %v1122_v49 = vadd.f32 %v1977_v39, %v1025_v1  ;;  %v1278_v9 = vmax.f32 %v1216_v47, 0.0  ;;  %v944_v20 = vadd.f32 %v1861_v24, %v2526_v57 }
 0x15f   :  { %v1979_v52 = vpop.f32.mrf.mxu0  ;;  %v2090_v8 = vpop.f32.mrf.mxu1 }
 0x160   :  { %v1980_v58 = vadd.f32 %v1979_v52, %v1978_v45  ;;  %v1219_v3 = vadd.f32 %v1218_v51, %v1122_v49  ;;  %v1925_v45 = vadd.f32 %v2578_v34, %v2573_v31 }
 0x161   :  { %v1981_v63 = vpop.f32.mrf.mxu0  ;;  %v1231_v1 = vpop.f32.mrf.mxu1 }
 0x162   :  { %v1127_v15 = vadd.f32 %v1980_v58, %v2556_v18  ;;  %v1279_v11 = vmax.f32 %v1219_v3, 0.0  ;;  %v1041_v5 = vadd.f32 %v1925_v45, %v944_v20 }
 0x163   :  { %v1982_v16 = vpop.f32.mrf.mxu0  ;;  %v2091_v51 = vpop.f32.mrf.mxu1 }
 0x164   :  { %v1294_v27 = vpack.c.bf16 %v1279_v11, %v1278_v9  ;;  %v1983_v29 = vadd.f32 %v1982_v16, %v1981_v63  ;;  %v1224_v33 = vadd.f32 %v2086_v23, %v1127_v15  ;;  %v1867_v23 = vadd.f32 %v2585_v42, %v2581_v38 }
 0x165   :  { %v1984_v61 = vpop.f32.mrf.mxu0  ;;  %v1234_v9 = vpop.f32.mrf.mxu1 }
 0x166   :  { %v1130_v39 = vadd.f32 %v1983_v29, %v1033_v22  ;;  %2116 = vmatprep.mubr.bf16.mxu1 %v1294_v27  ;;  %v1280_v52 = vmax.f32 %v1224_v33, 0.0 }
 0x167   :  { %v1985_v17 = vpop.f32.mrf.mxu0  ;;  %v2094_v42 = vpop.f32.mrf.mxu1 }
 0x168   :  { %v1227_v18 = vadd.f32 %v2087_v41, %v1130_v39  ;;  %v1986_v47 = vadd.f32 %v1985_v17, %v1984_v61  ;;  %v952_v41 = vadd.f32 %v1867_v23, %v2526_v57 }
 0x169   :  { %v1987_v49 = vpop.f32.mrf.mxu0 }
 0x16a   :  { %v1281_v2 = vmax.f32 %v1227_v18, 0.0  ;;  %v1135_v25 = vadd.f32 %v1986_v47, %v2575_v32  ;;  %v1931_v32 = vadd.f32 %v2591_v46, %v2587_v43  ;;  %v1247_v46 = vpop.f32.mrf.mxu1 }
 0x16b   :  { %v1988_v30 = vpop.f32.mrf.mxu0 }
 0x16c   :  { %v1295_v58 = vpack.c.bf16 %v1281_v2, %v1280_v52  ;;  %v1989_v3 = vadd.f32 %v1988_v30, %v1987_v49  ;;  %v1232_v15 = vadd.f32 %v1231_v1, %v1135_v25  ;;  %v1049_v61 = vadd.f32 %v1931_v32, %v952_v41 }
 0x16d   :  { %v1990_v63 = vpop.f32.mrf.mxu0  ;;  %v1885_v41 = vadd.f32 %v2618_v35, %v2615_v26 }
 0x16e   :  { %2117 = vmatmul.mubr.bf16.vlgmr.msra.gmra.mxu1 %v1295_v58  ;;  %v1138_v31 = vadd.f32 %v1989_v3, %v1041_v5  ;;  %v1282_v22 = vmax.f32 %v1232_v15, 0.0 }
 0x16f   :  { %v1991_v34 = vpop.f32.mrf.mxu0  ;;  %2172 = vmatpush3.bf16.msra.mxu1 %v2539_v6  ;;  %v1873_v6 = vadd.f32 %v2596_v54, %v2593_v50  ;;  %v2095_v54 = vpop.f32.mrf.mxu1 }
 0x170   :  { %v1992_v11 = vadd.f32 %v1991_v34, %v1990_v63  ;;  %v1235_v16 = vadd.f32 %v1234_v9, %v1138_v31  ;;  %2165 = vmatprep.subr.bf16.mxu1 %v2541_v7 }
 0x171   :  { %v1993_v38 = vpop.f32.mrf.mxu0 }
 0x172   :  { %v1143_v24 = vadd.f32 %v1992_v11, %v2589_v44  ;;  %v1283_v27 = vmax.f32 %v1235_v16, 0.0  ;;  %v960_v44 = vadd.f32 %v1873_v6, %v2526_v57 }
 0x173   :  { %v1994_v29 = vpop.f32.mrf.mxu0  ;;  %2173 = vmatpush3.bf16.msra.mxu1 %v2541_v7  ;;  %v1937_v7 = vadd.f32 %v2602_v59, %v2598_v55  ;;  %v1250_v59 = vpop.f32.mrf.mxu1 }
 0x174   :  { %v1296_v1 = vpack.c.bf16 %v1283_v27, %v1282_v22  ;;  %v1995_v33 = vadd.f32 %v1994_v29, %v1993_v38  ;;  %2166 = vmatprep.subr.bf16.mxu1 %v2550_v14  ;;  %v1240_v39 = vadd.f32 %v2090_v8, %v1143_v24  ;;  %v1949_v24 = vadd.f32 %v2624_v40, %v2620_v36 }
 0x175   :  { %v1996_v43 = vpop.f32.mrf.mxu0  ;;  %v1057_v2 = vadd.f32 %v1937_v7, %v960_v44  ;;  %v1955_v7 = vadd.f32 %v2637_v4, %v2633_v60  ;;  %v2340_v60 = vld [vmem:[#allocation8 + $0x10] sm:$0xff]   ;;  %v2341_v4 = vld [vmem:[#allocation8 + $0x8] sm:$0xff]  }
 0x176   :  { %v1146_v17 = vadd.f32 %v1995_v33, %v1049_v61  ;;  %2120 = vmatprep.mubr.bf16.mxu1 %v1296_v1  ;;  %v1284_v47 = vmax.f32 %v1240_v39, 0.0  ;;  %2142 = vmatprep.subr.bf16.mxu0 %v2340_v60 }
 0x177   :  { %v1997_v20 = vpop.f32.mrf.mxu0  ;;  %2174 = vmatpush3.bf16.msra.mxu1 %v2550_v14  ;;  %v1879_v14 = vadd.f32 %v2607_v10, %v2604_v0  ;;  %v2098_v10 = vpop.f32.mrf.mxu1  ;;  %2143 = vmatpush3.bf16.msra.mxu0 %v2340_v60 }
 0x178   :  { %v1243_v45 = vadd.f32 %v2091_v51, %v1146_v17  ;;  %v1998_v18 = vadd.f32 %v1997_v20, %v1996_v43  ;;  %2167 = vmatprep.subr.bf16.mxu1 %v2562_v21  ;;  %2144 = vmatprep.subr.bf16.mxu0 %v2341_v4 }
 0x179   :  { %v1999_v50 = vpop.f32.mrf.mxu0  ;;  %v1263_v16 = vpop.f32.mrf.mxu1 }
 0x17a   :  { %v1285_v49 = vmax.f32 %v1243_v45, 0.0  ;;  %v1151_v8 = vadd.f32 %v1998_v18, %v2600_v56  ;;  %v968_v56 = vadd.f32 %v1879_v14, %v2526_v57 }
 0x17b   :  { %v2000_v52 = vpop.f32.mrf.mxu0  ;;  %2175 = vmatpush3.bf16.msra.mxu1 %v2562_v21  ;;  %v1943_v21 = vadd.f32 %v2613_v19, %v2609_v12  ;;  %v976_v19 = vadd.f32 %v1885_v41, %v2526_v57  ;;  %v2099_v61 = vpop.f32.mrf.mxu1  ;;  %2145 = vmatpush3.bf16.msra.mxu0 %v2341_v4 }
 0x17c   :  { %v2001_v25 = vadd.f32 %v2000_v52, %v1999_v50  ;;  %v1297_v30 = vpack.c.bf16 %v1285_v49, %v1284_v47  ;;  %2168 = vmatprep.subr.bf16.mxu1 %v2569_v28  ;;  %v1248_v51 = vadd.f32 %v1247_v46, %v1151_v8 }
 0x17d   :  { %v2002_v55 = vpop.f32.mrf.mxu0  ;;  %v1065_v34 = vadd.f32 %v1943_v21, %v968_v56  ;;  %v1073_v33 = vadd.f32 %v1949_v24, %v976_v19  ;;  %v1266_v17 = vpop.f32.mrf.mxu1 }
 0x17e   :  { %2121 = vmatmul.mubr.bf16.gmra.mxu1 %v1297_v30  ;;  %v1154_v5 = vadd.f32 %v2001_v25, %v1057_v2  ;;  %v1286_v63 = vmax.f32 %v1248_v51, 0.0  ;;  %v1810_v51 = vld [vmem:[%s2707_s4] ss:$0 sm:$0xff] }
 0x17f   :  { %v2003_v23 = vpop.f32.mrf.mxu0  ;;  %2176 = vmatpush3.bf16.msra.mxu1 %v2569_v28 }
 0x180   :  { %v2004_v58 = vadd.f32 %v2003_v23, %v2002_v55  ;;  %v1251_v3 = vadd.f32 %v1250_v59, %v1154_v5  ;;  %2169 = vmatprep.subr.bf16.mxu1 %v2340_v60 }
 0x181   :  { %v2005_v0 = vpop.f32.mrf.mxu0 }
 0x182   :  { %v1159_v9 = vadd.f32 %v2004_v58, %v2611_v13  ;;  %v1287_v15 = vmax.f32 %v1251_v3, 0.0 }
 0x183   :  { %v2006_v31 = vpop.f32.mrf.mxu0  ;;  %2177 = vmatpush3.bf16.msra.mxu1 %v2340_v60 }
 0x184   :  { %v1298_v32 = vpack.c.bf16 %v1287_v15, %v1286_v63  ;;  %v2007_v28 = vadd.f32 %v2006_v31, %v2005_v0  ;;  %v1256_v38 = vadd.f32 %v2094_v42, %v1159_v9  ;;  %v1891_v42 = vadd.f32 %v2629_v53, %v2626_v48  ;;  %2170 = vmatprep.subr.bf16.mxu1 %v2341_v4 }
 0x185   :  { %v2008_v11 = vpop.f32.mrf.mxu0 }
 0x186   :  { %v1162_v22 = vadd.f32 %v2007_v28, %v1065_v34  ;;  %2124 = vmatprep.mubr.bf16.mxu1 %v1298_v32  ;;  %v1288_v6 = vmax.f32 %v1256_v38, 0.0  ;;  %v984_v44 = vadd.f32 %v1891_v42, %v2526_v57 }
 0x187   :  { %v2009_v12 = vpop.f32.mrf.mxu0  ;;  %2178 = vmatpush3.bf16.msra.mxu1 %v2341_v4 }
 0x188   :  { %v1259_v13 = vadd.f32 %v2095_v54, %v1162_v22  ;;  %v2010_v27 = vadd.f32 %v2009_v12, %v2008_v11  ;;  %v1081_v47 = vadd.f32 %v1955_v7, %v984_v44 }
 0x189   :  { %v2011_v29 = vpop.f32.mrf.mxu0 }
 0x18a   :  { %v1289_v1 = vmax.f32 %v1259_v13, 0.0  ;;  %v1167_v26 = vadd.f32 %v2010_v27, %v2622_v37 }
 0x18b   :  { %v2012_v35 = vpop.f32.mrf.mxu0 }
 0x18c   :  { %v2013_v43 = vadd.f32 %v2012_v35, %v2011_v29  ;;  %v1299_v46 = vpack.c.bf16 %v1289_v1, %v1288_v6  ;;  %v1264_v20 = vadd.f32 %v1263_v16, %v1167_v26 }
 0x18d   :  { %v2014_v39 = vpop.f32.mrf.mxu0 }
 0x18e   :  { %2125 = vmatmul.mubr.bf16.gmra.mxu1 %v1299_v46  ;;  %v1170_v36 = vadd.f32 %v2013_v43, %v1073_v33  ;;  %v1290_v50 = vmax.f32 %v1264_v20, 0.0 }
 0x18f   :  { %v2015_v40 = vpop.f32.mrf.mxu0 }
 0x190   :  { %v2016_v45 = vadd.f32 %v2015_v40, %v2014_v39  ;;  %v1267_v37 = vadd.f32 %v1266_v17, %v1170_v36 }
 0x191   :  { %v2017_v18 = vpop.f32.mrf.mxu0 }
 0x192   :  { %v1175_v54 = vadd.f32 %v2016_v45, %v2635_v62  ;;  %v1291_v48 = vmax.f32 %v1267_v37, 0.0  ;;  %v2342_v62 = vld [vmem:[#allocation8] sm:$0xff]  }
 0x193   :  { %v2018_v53 = vpop.f32.mrf.mxu0  ;;  %2146 = vmatprep.subr.bf16.mxu0 %v2342_v62  ;;  %2171 = vmatprep.subr.bf16.mxu1 %v2342_v62 }
 0x194   :  { %v1300_v49 = vpack.c.bf16 %v1291_v48, %v1290_v50  ;;  %v2019_v8 = vadd.f32 %v2018_v53, %v2017_v18  ;;  %v1272_v52 = vadd.f32 %v2098_v10, %v1175_v54  ;;  %2147 = vmatpush3.bf16.msra.mxu0 %v2342_v62  ;;  %2179 = vmatpush3.bf16.msra.mxu1 %v2342_v62 }
 0x196   :  { %v1178_v2 = vadd.f32 %v2019_v8, %v1081_v47  ;;  %2128 = vmatprep.mubr.bf16.mxu1 %v1300_v49  ;;  %v1292_v25 = vmax.f32 %v1272_v52, 0.0 }
 0x198   :  { %v1275_v14 = vadd.f32 %v2099_v61, %v1178_v2 }
 0x19a   :  { %v1293_v57 = vmax.f32 %v1275_v14, 0.0  ;;  %v1819_v14 = vld [vmem:[%s2709_s6] ss:$0 sm:$0xff]  ;;  %s2459_s6 = smov [#allocation10]  }
 0x19b   :  { %s1683_s25 = sshll.u32 %s2459_s6, 4  ;;  %s1684_s25 = int_to_ptr.vmem [resolvable:$true] %s1683_s25 }
 0x19c   :  { %v1301_v30 = vpack.c.bf16 %v1293_v57, %v1292_v25  ;;  %s2423_s26 = scalar_lea.vmem %s1684_s25, 2048  ;;  %p2428_p7 = scmp.lt.s32.totalorder %s1684_s25, %s1684_s25 }
 0x19d   :  { %p2424_p6 = scmp.ne.s32.totalorder %s1684_s25, %s2423_s26  ;;  %p2429_p8 = scmp.lt.s32.totalorder %s2423_s26, %s2423_s26 }
 0x19e   :  { %2129 = vmatmul.mubr.bf16.gmra.mxu1 %v1301_v30 }
 0x19f   :  { %p2430_p9 = por %p2429_p8, %p2428_p7 }
 0x1a1   :  { %p2431_p10 = pnand %p2430_p9, %p2424_p6 }
 0x22e   :  { %v2118_v55 = vpop.f32.mrf.mxu1 }
 0x22f   :  { %v1416_v21 = vadd.f32 %v2118_v55, %v1810_v51 }
 0x230   :  { %v1407_v59 = vpop.f32.mrf.mxu1 }
 0x231   :  { %v1408_v23 = vadd.f32 %v1810_v51, %v1407_v59  ;;  %v1472_v9 = vmax.f32 %v1416_v21, 0.0 }
 0x232   :  { %v2119_v5 = vpop.f32.mrf.mxu1 }
 0x233   :  { %v1419_v56 = vadd.f32 %v2119_v5, %v1810_v51  ;;  %v1470_v10 = vmax.f32 %v1408_v23, 0.0 }
 0x234   :  { %v1410_v58 = vpop.f32.mrf.mxu1 }
 0x235   :  { %v1411_v3 = vadd.f32 %v1810_v51, %v1410_v58  ;;  %v1473_v0 = vmax.f32 %v1419_v56, 0.0 }
 0x237   :  { %v1471_v63 = vmax.f32 %v1411_v3, 0.0  ;;  %v1487_v31 = vpack.c.bf16 %v1473_v0, %v1472_v9 }
 0x239   :  { %v1486_v15 = vpack.c.bf16 %v1471_v63, %v1470_v10 }
 0x23b   :  { %2148 = vmatprep.mubr.bf16.mxu0 %v1486_v15 }
 0x23c   :  { %2149 = vmatmul.mubr.bf16.vlgmr.msra.gmra.mxu0 %v1487_v31 }
 0x23e   :  { %v2122_v34 = vpop.f32.mrf.mxu1 }
 0x23f   :  { %v1432_v16 = vadd.f32 %v2122_v34, %v1810_v51 }
 0x240   :  { %v1423_v41 = vpop.f32.mrf.mxu1 }
 0x241   :  { %v1424_v28 = vadd.f32 %v1810_v51, %v1423_v41  ;;  %v1476_v13 = vmax.f32 %v1432_v16, 0.0 }
 0x242   :  { %v2123_v32 = vpop.f32.mrf.mxu1 }
 0x243   :  { %v1435_v11 = vadd.f32 %v2123_v32, %v1810_v51  ;;  %v1474_v19 = vmax.f32 %v1424_v28, 0.0 }
 0x244   :  { %v1426_v38 = vpop.f32.mrf.mxu1 }
 0x245   :  { %v1427_v22 = vadd.f32 %v1810_v51, %v1426_v38  ;;  %v1477_v12 = vmax.f32 %v1435_v11, 0.0 }
 0x247   :  { %v1475_v24 = vmax.f32 %v1427_v22, 0.0  ;;  %v1489_v29 = vpack.c.bf16 %v1477_v12, %v1476_v13 }
 0x249   :  { %v1488_v27 = vpack.c.bf16 %v1475_v24, %v1474_v19 }
 0x24b   :  { %2152 = vmatprep.mubr.bf16.mxu0 %v1488_v27 }
 0x24c   :  { %2153 = vmatmul.mubr.bf16.gmra.mxu0 %v1489_v29 }
 0x24e   :  { %v2126_v61 = vpop.f32.mrf.mxu1 }
 0x24f   :  { %v1448_v33 = vadd.f32 %v2126_v61, %v1810_v51 }
 0x250   :  { %v1439_v6 = vpop.f32.mrf.mxu1 }
 0x251   :  { %v1440_v26 = vadd.f32 %v1810_v51, %v1439_v6  ;;  %v1480_v20 = vmax.f32 %v1448_v33, 0.0 }
 0x252   :  { %v2127_v1 = vpop.f32.mrf.mxu1 }
 0x253   :  { %v1451_v35 = vadd.f32 %v2127_v1, %v1810_v51  ;;  %v1478_v39 = vmax.f32 %v1440_v26, 0.0 }
 0x254   :  { %v1442_v42 = vpop.f32.mrf.mxu1 }
 0x255   :  { %v1443_v43 = vadd.f32 %v1810_v51, %v1442_v42  ;;  %v1481_v46 = vmax.f32 %v1451_v35, 0.0 }
 0x257   :  { %v1479_v17 = vmax.f32 %v1443_v43, 0.0  ;;  %v1491_v40 = vpack.c.bf16 %v1481_v46, %v1480_v20 }
 0x259   :  { %v1490_v36 = vpack.c.bf16 %v1479_v17, %v1478_v39 }
 0x25b   :  { %2156 = vmatprep.mubr.bf16.mxu1 %v1490_v36 }
 0x25c   :  { %2157 = vmatmul.mubr.bf16.vlgmr.msra.gmra.mxu1 %v1491_v40 }
 0x25e   :  { %v2130_v44 = vpop.f32.mrf.mxu1 }
 0x25f   :  { %v1464_v50 = vadd.f32 %v2130_v44, %v1810_v51 }
 0x260   :  { %v1455_v7 = vpop.f32.mrf.mxu1 }
 0x261   :  { %v1456_v37 = vadd.f32 %v1810_v51, %v1455_v7  ;;  %v1484_v8 = vmax.f32 %v1464_v50, 0.0 }
 0x262   :  { %v2131_v45 = vpop.f32.mrf.mxu1 }
 0x263   :  { %v1467_v18 = vadd.f32 %v2131_v45, %v1810_v51  ;;  %v1482_v47 = vmax.f32 %v1456_v37, 0.0 }
 0x264   :  { %v1458_v54 = vpop.f32.mrf.mxu1 }
 0x265   :  { %v1459_v48 = vadd.f32 %v1810_v51, %v1458_v54  ;;  %v1485_v53 = vmax.f32 %v1467_v18, 0.0 }
 0x267   :  { %v1483_v49 = vmax.f32 %v1459_v48, 0.0  ;;  %v1493_v2 = vpack.c.bf16 %v1485_v53, %v1484_v8 }
 0x269   :  { %v1492_v52 = vpack.c.bf16 %v1483_v49, %v1482_v47 }
 0x26b   :  { %2160 = vmatprep.mubr.bf16.mxu1 %v1492_v52 }
 0x26c   :  { %2161 = vmatmul.mubr.bf16.gmra.mxu1 %v1493_v2 }
 0x2fc   :  { %v2150_v25 = vpop.f32.mrf.mxu0 }
 0x2fd   :  { %v1608_v57 = vadd.f32 %v2150_v25, %v1819_v14 }
 0x2fe   :  { %v1599_v30 = vpop.f32.mrf.mxu0 }
 0x2ff   :  { %1664 = vst [vmem:[#allocation10 + $0x10] sm:$0xff] %v1608_v57  ;;  %v1600_v60 = vadd.f32 %v1819_v14, %v1599_v30 }
 0x300   :  { %v2151_v4 = vpop.f32.mrf.mxu0 }
 0x301   :  { %1662 = vst [vmem:[#allocation10] sm:$0xff] %v1600_v60  ;;  %v1611_v62 = vadd.f32 %v2151_v4, %v1819_v14 }
 0x302   :  { %v1602_v55 = vpop.f32.mrf.mxu0 }
 0x303   :  { %1665 = vst [vmem:[#allocation10 + $0x18] sm:$0xff] %v1611_v62  ;;  %v1603_v59 = vadd.f32 %v1819_v14, %v1602_v55 }
 0x305   :  { %1663 = vst [vmem:[#allocation10 + $0x8] sm:$0xff] %v1603_v59 }
 0x30c   :  { %v2154_v51 = vpop.f32.mrf.mxu0 }
 0x30d   :  { %v1624_v5 = vadd.f32 %v2154_v51, %v1819_v14 }
 0x30e   :  { %v1615_v23 = vpop.f32.mrf.mxu0 }
 0x30f   :  { %1668 = vst [vmem:[#allocation10 + $0x30] sm:$0xff] %v1624_v5  ;;  %v1616_v56 = vadd.f32 %v1819_v14, %v1615_v23 }
 0x310   :  { %v2155_v21 = vpop.f32.mrf.mxu0 }
 0x311   :  { %1666 = vst [vmem:[#allocation10 + $0x20] sm:$0xff] %v1616_v56  ;;  %v1627_v58 = vadd.f32 %v2155_v21, %v1819_v14 }
 0x312   :  { %v1618_v3 = vpop.f32.mrf.mxu0 }
 0x313   :  { %1669 = vst [vmem:[#allocation10 + $0x38] sm:$0xff] %v1627_v58  ;;  %v1619_v0 = vadd.f32 %v1819_v14, %v1618_v3 }
 0x315   :  { %1667 = vst [vmem:[#allocation10 + $0x28] sm:$0xff] %v1619_v0 }
 0x31c   :  { %v2158_v10 = vpop.f32.mrf.mxu1 }
 0x31d   :  { %v1640_v63 = vadd.f32 %v2158_v10, %v1819_v14 }
 0x31e   :  { %v1631_v9 = vpop.f32.mrf.mxu1 }
 0x31f   :  { %1672 = vst [vmem:[#allocation10 + $0x50] sm:$0xff] %v1640_v63  ;;  %v1632_v15 = vadd.f32 %v1819_v14, %v1631_v9 }
 0x320   :  { %v2159_v31 = vpop.f32.mrf.mxu1 }
 0x321   :  { %1670 = vst [vmem:[#allocation10 + $0x40] sm:$0xff] %v1632_v15  ;;  %v1643_v34 = vadd.f32 %v2159_v31, %v1819_v14 }
 0x322   :  { %v1634_v41 = vpop.f32.mrf.mxu1 }
 0x323   :  { %1673 = vst [vmem:[#allocation10 + $0x58] sm:$0xff] %v1643_v34  ;;  %v1635_v32 = vadd.f32 %v1819_v14, %v1634_v41 }
 0x325   :  { %1671 = vst [vmem:[#allocation10 + $0x48] sm:$0xff] %v1635_v32 }
 0x32c   :  { %v2162_v28 = vpop.f32.mrf.mxu1 }
 0x32d   :  { %v1656_v11 = vadd.f32 %v2162_v28, %v1819_v14 }
 0x32e   :  { %v1647_v16 = vpop.f32.mrf.mxu1 }
 0x32f   :  { %1676 = vst [vmem:[#allocation10 + $0x70] sm:$0xff] %v1656_v11  ;;  %v1648_v38 = vadd.f32 %v1819_v14, %v1647_v16 }
 0x330   :  { %v2163_v22 = vpop.f32.mrf.mxu1 }
 0x331   :  { %1674 = vst [vmem:[#allocation10 + $0x60] sm:$0xff] %v1648_v38  ;;  %v1659_v12 = vadd.f32 %v2163_v22, %v1819_v14 }
 0x332   :  { %v1650_v19 = vpop.f32.mrf.mxu1 }
 0x333   :  { %1677 = vst [vmem:[#allocation10 + $0x78] sm:$0xff] %v1659_v12  ;;  %v1651_v24 = vadd.f32 %v1819_v14, %v1650_v19 }
 0x335   :  { %1675 = vst [vmem:[#allocation10 + $0x68] sm:$0xff] %v1651_v24 }
 0x336   :  { %2434 = shalt.err (!%p2431_p10)
}
 0x337   :  { %s2460_s27 = smov 128   ;;  %s2461_s28 = smov 8  }
 0x338   :  { %1689 = dma.vmem_to_hbm [thread:$0]  %s1684_s25, 2048, %s2710_s7, [#allocation4], %s2460_s27, %s2460_s27, %s2461_s28  }
 0x339   :  { %2449 = dma.done.wait [#allocation4], 2048  }
 0x33a   :  { %2450 = vsyncadd [#allocation4], 4294965248 }
 0x33b   :  { %1693 = vsyncpa [#allocation3], 1 }
 0x33c   :  { %1694 = vsyncpa [#allocation6], 1 }
 0x33d   :  { %1695 = vsyncpa [#allocation9], 1 }
 0x33e   :  { %1696 = vsyncpa [#allocation4], 1 }

</bundles_post_ra>
